<compile_context>
chip_gen: v7x
topology: tpu7x:2x2x1
jax: 0.10.0
libtpu: 0.0.40
codegen_flags: <defaults>
</compile_context>

<pallas_src>
import math

import jax
import jax.numpy as jnp
from jax import lax
from jax.experimental import pallas as pl
from jax.experimental.pallas import tpu as pltpu

B = 8      # batch
F = 32     # feature_dim
H = 4      # num_heads
DH = F // H


def feature_attention_kernel(x_ref, w_ref, b_ref, out_ref):
    x = x_ref[...].astype(jnp.float32)

    def linear(inp, i):
        # w_ref is [3, F, F] (pre-transposed so y = x @ W^T), b_ref is [3, F].
        return (jnp.dot(inp, w_ref[i], preferred_element_type=jnp.float32)
                + b_ref[i:i + 1, :].astype(jnp.float32))

    # ---- MultiheadAttention with seq_len == 1: softmax over one key == 1, so
    #      attn_output = out_proj(v_proj(x)); both projections folded into slab 0. ----
    attn_out = linear(x, 0)

    # ---- feature_importance: Linear -> GELU(exact) -> Linear -> Softmax(dim=-1) ----
    h1 = linear(attn_out, 1)
    h1 = 0.5 * h1 * (1.0 + lax.erf(h1 * (1.0 / math.sqrt(2.0))))   # exact GELU (PyTorch default)
    logits = linear(h1, 2)
    logits = logits - jnp.max(logits, axis=-1, keepdims=True)
    e = jnp.exp(logits)
    aw = e / jnp.sum(e, axis=-1, keepdims=True)

    # Single lane-dense output slab: [weighted_features | attention_weights].
    out_ref[...] = jnp.concatenate([x * aw, aw], axis=-1).astype(out_ref.dtype)


def feature_attention(x, w_packed, b_packed):
    Bx, Fx = x.shape
    # Batch tile: full batch for small B (single step), 128-row tiles for large B.
    # The batch axis is embarrassingly parallel -> "parallel" semantics; weights stay
    # resident (index_map returns the same block every step).
    tb = Bx if Bx <= 128 else 128
    grid = (pl.cdiv(Bx, tb),)
    out = pl.pallas_call(
        feature_attention_kernel,
        out_shape=jax.ShapeDtypeStruct((Bx, 2 * Fx), x.dtype),
        grid=grid,
        in_specs=[
            pl.BlockSpec((tb, Fx), lambda i: (i, 0)),
            pl.BlockSpec((3, Fx, Fx), lambda i: (0, 0, 0)),   # resident across steps
            pl.BlockSpec((3, Fx), lambda i: (0, 0)),          # resident across steps
        ],
        out_specs=pl.BlockSpec((tb, 2 * Fx), lambda i: (i, 0)),
        compiler_params=pltpu.CompilerParams(dimension_semantics=("parallel",)),
    )(x, w_packed, b_packed)
    return out[:, :Fx], out[:, Fx:]


def reference(x, in_proj_w, in_proj_b, out_proj_w, out_proj_b,
              lin1_w, lin1_b, lin2_w, lin2_b):
    """Faithful (unfolded) reference of the PyTorch forward."""
    wq, wk, wv = in_proj_w[:F], in_proj_w[F:2 * F], in_proj_w[2 * F:]
    bq, bk, bv = in_proj_b[:F], in_proj_b[F:2 * F], in_proj_b[2 * F:]
    q = x @ wq.T + bq
    k = x @ wk.T + bk
    v = x @ wv.T + bv
    scale = 1.0 / math.sqrt(DH)
    outs = []
    for h in range(H):
        sl = slice(h * DH, (h + 1) * DH)
        s = jnp.sum(q[:, sl] * k[:, sl], axis=-1, keepdims=True) * scale
        p = jax.nn.softmax(s[:, None, :], axis=-1)[:, 0, :]     # softmax over 1 key
        outs.append(p * v[:, sl])
    attn = jnp.concatenate(outs, axis=-1)
    attn_out = attn @ out_proj_w.T + out_proj_b
    h1 = jax.nn.gelu(attn_out @ lin1_w.T + lin1_b, approximate=False)
    aw = jax.nn.softmax(h1 @ lin2_w.T + lin2_b, axis=-1)
    return x * aw, aw


if __name__ == "__main__":
    key = jax.random.PRNGKey(0)
    ks = jax.random.split(key, 10)

    # Deterministic synthetic parameters (shapes follow nn.MultiheadAttention / nn.Linear).
    in_proj_w = jax.random.normal(ks[0], (3 * F, F), jnp.float32) * 0.1   # [3F, F]
    in_proj_b = jax.random.normal(ks[1], (3 * F,), jnp.float32) * 0.1
    out_proj_w = jax.random.normal(ks[2], (F, F), jnp.float32) * 0.1
    out_proj_b = jax.random.normal(ks[3], (F,), jnp.float32) * 0.1
    lin1_w = jax.random.normal(ks[4], (F, F), jnp.float32) * 0.1
    lin1_b = jax.random.normal(ks[5], (F,), jnp.float32) * 0.1
    lin2_w = jax.random.normal(ks[6], (F, F), jnp.float32) * 0.1
    lin2_b = jax.random.normal(ks[7], (F,), jnp.float32) * 0.1

    # Offline algebraic fold: softmax over one key is identity, so
    #   attn_output = (x @ Wv^T + bv) @ Wo^T + bo = x @ (Wv^T Wo^T) + (bv @ Wo^T + bo).
    wv_t = in_proj_w[2 * F:3 * F].T                    # [F, F]
    bv = in_proj_b[2 * F:3 * F]
    wvo_t = wv_t @ out_proj_w.T                        # [F, F]
    bvo = bv @ out_proj_w.T + out_proj_b               # [F]

    # Pack weights/biases into dense slabs (3 input DMAs total).
    w_packed = jnp.stack([wvo_t, lin1_w.T, lin2_w.T], axis=0)   # [3, F, F]
    b_packed = jnp.stack([bvo, lin1_b, lin2_b], axis=0)         # [3, F]

    x = jax.random.normal(ks[8], (B, F), jnp.float32)

    wf, aw = feature_attention(x, w_packed, b_packed)
    jax.block_until_ready((wf, aw))

    wf_ref, aw_ref = reference(x, in_proj_w, in_proj_b, out_proj_w, out_proj_b,
                               lin1_w, lin1_b, lin2_w, lin2_b)
    assert jnp.allclose(wf, wf_ref, atol=1e-3, rtol=1e-3)
    assert jnp.allclose(aw, aw_ref, atol=1e-3, rtol=1e-3)

    print("KERNEL_OK")
</pallas_src>

<mosaic_0001>
module attributes {stable_mosaic.version = 11 : i64} {
  func.func @feature_attention_kernel(%arg0: i32, %arg1: memref<8x32xf32, #tpu.memory_space<vmem>>, %arg2: memref<3x32x32xf32, #tpu.memory_space<vmem>>, %arg3: memref<3x32xf32, #tpu.memory_space<vmem>>, %arg4: memref<8x64xf32, #tpu.memory_space<vmem>>) attributes {dimension_semantics = [#tpu.dimension_semantics<parallel>], iteration_bounds = array<i64: 1>, scalar_prefetch = 0 : i64, scratch_operands = 0 : i64, tpu.core_type = #tpu.core_type<tc>, window_params = [{transform_indices = @transform_0, window_bounds = array<i64: 8, 32>}, {pipeline_mode = #tpu.pipeline_mode<synchronous>, transform_indices = @transform_1, window_bounds = array<i64: 3, 32, 32>}, {pipeline_mode = #tpu.pipeline_mode<synchronous>, transform_indices = @transform_2, window_bounds = array<i64: 3, 32>}, {transform_indices = @transform_3, window_bounds = array<i64: 8, 64>}]} {
    %c0 = arith.constant 0 : index
    %c0_0 = arith.constant 0 : index
    %0 = vector.load %arg1[%c0, %c0_0] : memref<8x32xf32, #tpu.memory_space<vmem>>, vector<8x32xf32>
    %c0_1 = arith.constant 0 : index
    %c0_2 = arith.constant 0 : index
    %c0_3 = arith.constant 0 : index
    %1 = vector.load %arg2[%c0_1, %c0_2, %c0_3] : memref<3x32x32xf32, #tpu.memory_space<vmem>>, vector<1x32x32xf32>
    %2 = vector.shape_cast %1 : vector<1x32x32xf32> to vector<32x32xf32>
    %cst = arith.constant dense<0.000000e+00> : vector<8x32xf32>
    %3 = tpu.matmul %0, %2, %cst {dimension_numbers = #tpu.dot_dimension_numbers<[1], [0], [0], [1], [0, 0, 1, 1], [], []>} : vector<8x32xf32>, vector<32x32xf32>, vector<8x32xf32> -> vector<8x32xf32>
    %c0_4 = arith.constant 0 : index
    %c0_5 = arith.constant 0 : index
    %4 = vector.load %arg3[%c0_4, %c0_5] : memref<3x32xf32, #tpu.memory_space<vmem>>, vector<1x32xf32>
    %5 = vector.broadcast %4 : vector<1x32xf32> to vector<8x32xf32>
    %6 = arith.addf %3, %5 : vector<8x32xf32>
    %c1 = arith.constant 1 : index
    %c0_6 = arith.constant 0 : index
    %c0_7 = arith.constant 0 : index
    %7 = vector.load %arg2[%c1, %c0_6, %c0_7] : memref<3x32x32xf32, #tpu.memory_space<vmem>>, vector<1x32x32xf32>
    %8 = vector.shape_cast %7 : vector<1x32x32xf32> to vector<32x32xf32>
    %cst_8 = arith.constant dense<0.000000e+00> : vector<8x32xf32>
    %9 = tpu.matmul %6, %8, %cst_8 {dimension_numbers = #tpu.dot_dimension_numbers<[1], [0], [0], [1], [0, 0, 1, 1], [], []>} : vector<8x32xf32>, vector<32x32xf32>, vector<8x32xf32> -> vector<8x32xf32>
    %c1_9 = arith.constant 1 : index
    %c0_10 = arith.constant 0 : index
    %10 = vector.load %arg3[%c1_9, %c0_10] : memref<3x32xf32, #tpu.memory_space<vmem>>, vector<1x32xf32>
    %11 = vector.broadcast %10 : vector<1x32xf32> to vector<8x32xf32>
    %12 = arith.addf %9, %11 : vector<8x32xf32>
    %cst_11 = arith.constant 5.000000e-01 : f32
    %13 = vector.broadcast %cst_11 : f32 to vector<8x32xf32>
    %14 = arith.mulf %13, %12 : vector<8x32xf32>
    %cst_12 = arith.constant 0.707106769 : f32
    %15 = vector.broadcast %cst_12 : f32 to vector<8x32xf32>
    %16 = arith.mulf %12, %15 : vector<8x32xf32>
    %17 = math.erf %16 : vector<8x32xf32>
    %cst_13 = arith.constant 1.000000e+00 : f32
    %18 = vector.broadcast %cst_13 : f32 to vector<8x32xf32>
    %19 = arith.addf %18, %17 : vector<8x32xf32>
    %20 = arith.mulf %14, %19 : vector<8x32xf32>
    %c2 = arith.constant 2 : index
    %c0_14 = arith.constant 0 : index
    %c0_15 = arith.constant 0 : index
    %21 = vector.load %arg2[%c2, %c0_14, %c0_15] : memref<3x32x32xf32, #tpu.memory_space<vmem>>, vector<1x32x32xf32>
    %22 = vector.shape_cast %21 : vector<1x32x32xf32> to vector<32x32xf32>
    %cst_16 = arith.constant dense<0.000000e+00> : vector<8x32xf32>
    %23 = tpu.matmul %20, %22, %cst_16 {dimension_numbers = #tpu.dot_dimension_numbers<[1], [0], [0], [1], [0, 0, 1, 1], [], []>} : vector<8x32xf32>, vector<32x32xf32>, vector<8x32xf32> -> vector<8x32xf32>
    %c2_17 = arith.constant 2 : index
    %c0_18 = arith.constant 0 : index
    %24 = vector.load %arg3[%c2_17, %c0_18] : memref<3x32xf32, #tpu.memory_space<vmem>>, vector<1x32xf32>
    %25 = vector.broadcast %24 : vector<1x32xf32> to vector<8x32xf32>
    %26 = arith.addf %23, %25 : vector<8x32xf32>
    %cst_19 = arith.constant dense<0xFF800000> : vector<8xf32>
    %27 = vector.multi_reduction <maximumf>, %26, %cst_19 [1] : vector<8x32xf32> to vector<8xf32>
    %28 = vector.shape_cast %27 : vector<8xf32> to vector<8x1xf32>
    %29 = vector.broadcast %28 : vector<8x1xf32> to vector<8x32xf32>
    %30 = arith.subf %26, %29 : vector<8x32xf32>
    %31 = math.exp %30 : vector<8x32xf32>
    %cst_20 = arith.constant dense<0.000000e+00> : vector<8xf32>
    %32 = vector.multi_reduction <add>, %31, %cst_20 [1] : vector<8x32xf32> to vector<8xf32>
    %33 = vector.shape_cast %32 : vector<8xf32> to vector<8x1xf32>
    %34 = vector.broadcast %33 : vector<8x1xf32> to vector<8x32xf32>
    %35 = arith.divf %31, %34 : vector<8x32xf32>
    %36 = arith.mulf %0, %35 : vector<8x32xf32>
    %37 = tpu.concatenate %36, %35 in 1 : vector<8x32xf32>, vector<8x32xf32> -> vector<8x64xf32>
    %c0_21 = arith.constant 0 : index
    %c0_22 = arith.constant 0 : index
    %38 = vector.load %arg4[%c0_21, %c0_22] : memref<8x64xf32, #tpu.memory_space<vmem>>, vector<8x64xf32>
    tpu.vector_store %arg4[%c0_21, %c0_22], %37 {strides = array<i32>} : memref<8x64xf32, #tpu.memory_space<vmem>>, vector<8x64xf32>,
    return
  }
  func.func @transform_0(%arg0: i32) -> (i32, i32) {
    %c0_i32 = arith.constant 0 : i32
    %c0_i32_0 = arith.constant 0 : i32
    return %arg0, %c0_i32 : i32, i32
  }
  func.func @transform_1(%arg0: i32) -> (i32, i32, i32) {
    %c0_i32 = arith.constant 0 : i32
    %c0_i32_0 = arith.constant 0 : i32
    %c0_i32_1 = arith.constant 0 : i32
    %c0_i32_2 = arith.constant 0 : i32
    return %c0_i32, %c0_i32_0, %c0_i32_1 : i32, i32, i32
  }
  func.func @transform_2(%arg0: i32) -> (i32, i32) {
    %c0_i32 = arith.constant 0 : i32
    %c0_i32_0 = arith.constant 0 : i32
    %c0_i32_1 = arith.constant 0 : i32
    return %c0_i32, %c0_i32_0 : i32, i32
  }
  func.func @transform_3(%arg0: i32) -> (i32, i32) {
    %c0_i32 = arith.constant 0 : i32
    %c0_i32_0 = arith.constant 0 : i32
    return %arg0, %c0_i32 : i32, i32
  }
}

</mosaic_0001>

<bundles_post_ra>
// kernel: tpu_custom_call.1
= control target key start
LH: loop header
LB: loop body
LE: loop exit
PB: predicated region body
PF: predicated region fallthrough
CT: control target
= control target key end

     0   :  { %8 = vsyncpa [#allocation3], 0  ;;  %s580_s0 = inlined_call_operand.hbm [shape: f32[8,32], index: 0, kind: input, shape index: {}]   ;;  %s581_s1 = inlined_call_operand.hbm [shape: f32[3,32,32], index: 1, kind: input, shape index: {}]   ;;  %s582_s2 = inlined_call_operand.vmem [shape: f32[3,32], index: 2, kind: input, shape index: {}]   ;;  %s583_s3 = inlined_call_operand.hbm [shape: f32[8,64], index: 3, kind: output, shape index: {}]  }
   0x1   :  { %9 = vsyncpa [#allocation6], 0 }
   0x2   :  { %10 = vsyncpa [#allocation4], 0  ;;  %s490_s12 = smov [#allocation2]   ;;  %s491_s14 = smov [#allocation5]  }
   0x3   :  { %s17_s13 = sshll.u32 %s490_s12, 4  ;;  %s26_s15 = sshll.u32 %s491_s14, 4  ;;  %s18_s13 = int_to_ptr.vmem [resolvable:$true] %s17_s13  ;;  %s519_s15 = int_to_ptr.vmem [resolvable:$true] %s26_s15 }
   0x4   :  { %s418_s18 = scalar_lea.hbm %s580_s0, 128 }
   0x5   :  { %p419_p0 = scmp.ne.s32.totalorder %s580_s0, %s418_s18  ;;  %p422_p1 = scmp.lt.u32.totalorder %s418_s18, %s580_s0 }
   0x7   :  { %p424_p2 = pnand %p422_p1, %p419_p0 }
   0x9   :  { %427 = shalt.err (!%p424_p2)
}
   0xa   :  { %s428_s23 = scalar_lea.vmem %s18_s13, 128  ;;  %p433_p4 = scmp.lt.s32.totalorder %s18_s13, %s18_s13 }
   0xb   :  { %p429_p3 = scmp.ne.s32.totalorder %s18_s13, %s428_s23  ;;  %p434_p5 = scmp.lt.s32.totalorder %s428_s23, %s428_s23 }
   0xd   :  { %p435_p6 = por %p434_p5, %p433_p4 }
   0xf   :  { %p436_p7 = pnand %p435_p6, %p429_p3 }
  0x11   :  { %439 = shalt.err (!%p436_p7)
}
  0x12   :  { %20 = dma.hbm_to_vmem [thread:$0]  %s580_s0, 128, %s18_s13, [#allocation3]  }
  0x13   :  { %s440_s28 = scalar_lea.hbm %s581_s1, 1536 }
  0x14   :  { %p441_p8 = scmp.ne.s32.totalorder %s581_s1, %s440_s28  ;;  %p444_p9 = scmp.lt.u32.totalorder %s440_s28, %s581_s1 }
  0x16   :  { %p446_p10 = pnand %p444_p9, %p441_p8 }
  0x18   :  { %449 = shalt.err (!%p446_p10)
}
  0x19   :  { %s450_s6 = scalar_lea.vmem %s519_s15, 1536  ;;  %p455_p12 = scmp.lt.s32.totalorder %s519_s15, %s519_s15 }
  0x1a   :  { %p451_p11 = scmp.ne.s32.totalorder %s519_s15, %s450_s6  ;;  %p456_p13 = scmp.lt.s32.totalorder %s450_s6, %s450_s6 }
  0x1c   :  { %p457_p0 = por %p456_p13, %p455_p12 }
  0x1e   :  { %p458_p1 = pnand %p457_p0, %p451_p11 }
  0x20   :  { %461 = shalt.err (!%p458_p1)
}
  0x21   :  { %s492_s0 = smov 128   ;;  %s493_s7 = smov 8  }
  0x22   :  { %32 = dma.hbm_to_vmem [thread:$0]  %s581_s1, 1536, %s519_s15, [#allocation6], %s492_s0, %s492_s0, %s493_s7  }
  0x23   :  { %484 = dma.done.wait [#allocation3], 128  }
  0x24   :  { %485 = vsyncadd [#allocation3], 4294967168 }
  0x25   :  { %486 = dma.done.wait [#allocation6], 1536  }
  0x26   :  { %487 = vsyncadd [#allocation6], 4294965760  ;;  %v494_v0 = vmov 0.0|0.0   ;;  %vm495_vm0 = vmmov 0   ;;  %v496_v1 = vmov 0.0   ;;  %v42_v2 = vld [vmem:[#allocation5] sm:$0xff] }
  0x27   :  { %385 = vmatprep.subr.bf16.mxu0 %v494_v0  ;;  %360 = vmatprep.mubr.msk.f32.mxu0 %vm495_vm0, %v496_v1  ;;  %v43_v3 = vld [vmem:[#allocation5 + $0x8] sm:$0xff]  ;;  %v44_v4 = vld [vmem:[#allocation5 + $0x10] sm:$0xff]  ;;  %v45_v6 = vld [vmem:[#allocation5 + $0x18] sm:$0xff]  ;;  %vm51_vm1 = vcmask 261120   ;;  %s497_s15 = smov 32   ;;  %vm313_vm2 = vcmask 523264  }
  0x28   :  { %391 = vmatprep.subr.bf16.mxu1 %v494_v0  ;;  %371 = vmatprep.mubr.msk.f32.mxu1 %vm495_vm0, %v496_v1  ;;  %v386_v5 = vpack.c.bf16 %v43_v3, %v42_v2  ;;  %v126_v7 = vld [vmem:[#allocation5 + $0x20] sm:$0xff]  ;;  %v127_v8 = vld [vmem:[#allocation5 + $0x28] sm:$0xff]  ;;  %v389_v9 = vpack.c.bf16 %v45_v6, %v44_v4  ;;  %v41_v11 = vld [vmem:[#allocation2] sm:$0xff] }
  0x29   :  { %v392_v10 = vpack.c.bf16 %v127_v8, %v126_v7  ;;  %v128_v12 = vld [vmem:[#allocation5 + $0x30] sm:$0xff]  ;;  %v129_v13 = vld [vmem:[#allocation5 + $0x38] sm:$0xff]  ;;  %v214_v19 = vld [vmem:[#allocation5 + $0x40] sm:$0xff] }
  0x2a   :  { %387 = vmatpush3.bf16.msra.mxu0 %v386_v5  ;;  %v395_v14 = vpack.c.bf16 %v129_v13, %v128_v12  ;;  %v331_v15 = vld [vmem:[%s582_s2] ss:$0 sm:$0xff]  ;;  %v215_v20 = vld [vmem:[#allocation5 + $0x48] sm:$0xff]  ;;  %v216_v22 = vld [vmem:[#allocation5 + $0x50] sm:$0xff] }
  0x2b   :  { %388 = vmatprep.subr.bf16.mxu0 %v494_v0  ;;  %393 = vmatpush3.bf16.msra.mxu1 %v392_v10  ;;  %v398_v21 = vpack.c.bf16 %v215_v20, %v214_v19  ;;  %v217_v23 = vld [vmem:[#allocation5 + $0x58] sm:$0xff] }
  0x2c   :  { %394 = vmatprep.subr.bf16.mxu1 %v494_v0  ;;  %v401_v24 = vpack.c.bf16 %v217_v23, %v216_v22  ;;  %v333_v25 = vld [vmem:[%s582_s2 + $0x1] ss:$0 sm:$0xff]  ;;  %v335_v34 = vld [vmem:[%s582_s2 + $0x2] ss:$0 sm:$0xff]  ;;  %s498_s2 = smov [#allocation7]  }
  0x2d   :  { %s321_s16 = sshll.u32 %s498_s2, 4  ;;  %s322_s16 = int_to_ptr.vmem [resolvable:$true] %s321_s16 }
  0x2e   :  { %390 = vmatpush3.bf16.msra.mxu0 %v389_v9  ;;  %s462_s17 = scalar_lea.vmem %s322_s16, 128  ;;  %p467_p3 = scmp.lt.s32.totalorder %s322_s16, %s322_s16 }
  0x2f   :  { %397 = vmatprep.subr.bf16.mxu0 %v494_v0  ;;  %396 = vmatpush3.bf16.msra.mxu1 %v395_v14  ;;  %p463_p2 = scmp.ne.s32.totalorder %s322_s16, %s462_s17  ;;  %p468_p4 = scmp.lt.s32.totalorder %s462_s17, %s462_s17 }
  0x31   :  { %361 = vmatmul.mubr.msk.f32.vlgmr.msra.gmra.mrb[0].mxu0 %vm51_vm1, %v41_v11  ;;  %p469_p5 = por %p468_p4, %p467_p3 }
  0x32   :  { %382 = vmatprep.mubr.msk.f32.mxu0 %vm495_vm0, %v496_v1  ;;  %399 = vmatpush3.bf16.msra.mxu0 %v398_v21 }
  0x33   :  { %400 = vmatprep.subr.bf16.mxu0 %v494_v0  ;;  %p470_p6 = pnand %p469_p5, %p463_p2 }
  0x36   :  { %402 = vmatpush3.bf16.msra.mxu0 %v401_v24 }
 0x104   :  { %v121_v16 = vpop.f32.mrb[0].mxu0 }
 0x105   :  { %v122_v17 = vadd.f32 %v331_v15, %v121_v16  ;;  %v362_v18 = vpop.f32.mrb[1].mxu0 }
 0x107   :  { %372 = vmatmul.mubr.msk.f32.vlgmr.msra.gmra.mrb[0].mxu1 %vm51_vm1, %v122_v17 }
 0x1da   :  { %v204_v26 = vpop.f32.mrb[0].mxu1 }
 0x1db   :  { %v205_v27 = vadd.f32 %v333_v25, %v204_v26  ;;  %v373_v28 = vpop.f32.mrb[1].mxu1 }
 0x1dd   :  { %v209_v29 = vmul.f32 0.70710677, %v205_v27  ;;  %v208_v31 = vmul.f32 0.5, %v205_v27 }
 0x1df   :  { %412 = verf.f32 %v209_v29 }
 0x1e9   :  { %v413_v30 = vpop.eup %412 }
 0x1ea   :  { %v211_v32 = vadd.f32 1.0, %v413_v30 }
 0x1ec   :  { %v212_v33 = vmul.f32 %v211_v32, %v208_v31 }
 0x1ee   :  { %383 = vmatmul.mubr.msk.f32.vlgmr.msra.gmra.mrb[2].mxu0 %vm51_vm1, %v212_v33 }
 0x2c1   :  { %v292_v35 = vpop.f32.mrb[2].mxu0 }
 0x2c2   :  { %v293_v36 = vadd.f32 %v335_v34, %v292_v35  ;;  %v384_v37 = vpop.f32.mrb[3].mxu0 }
 0x2c4   :  { %v296_v38 = vsel %vm51_vm1, %v293_v36, -inf }
 0x2c5   :  { %297 = vmax.xlane.f32.xlu0 %v296_v38 }
 0x352   :  { %v298_v39 = vpop.xlane.xlu0 %297 }
 0x353   :  { %v299_v40 = vsub.f32 %v293_v36, %v298_v39 }
 0x355   :  { %v300_v41 = vmul.f32 1.442695, %v299_v40 }
 0x357   :  { %414 = vpow2.f32 %v300_v41 }
 0x361   :  { %v415_v42 = vpop.eup %414 }
 0x362   :  { %v302_v43 = vsel %vm51_vm1, %v415_v42, 0.0 }
 0x363   :  { %303 = vadd.xlane.f32.xlu0 %v302_v43 }
 0x3f0   :  { %v304_v44 = vpop.xlane.xlu0 %303 }
 0x3f1   :  { %416 = vrcp.f32 %v304_v44 }
 0x3fb   :  { %v417_v45 = vpop.eup %416 }
 0x3fc   :  { %v306_v46 = vmul.f32 %v417_v45, %v415_v42 }
 0x3fe   :  { %309 = vrot.lane.b32.xlu1 %v306_v46, %s497_s15  ;;  %v307_v47 = vmul.f32 %v306_v46, %v41_v11 }
 0x470   :  { %v310_v48 = vpop.permute.xlu1 %309 }
 0x471   :  { %v312_v49 = vsel %vm51_vm1, %v307_v47, %v310_v48 }
 0x472   :  { %314 = vst.msk [vmem:[#allocation7] sm:$0xff] %vm313_vm2, %v312_v49 }
 0x473   :  { %473 = shalt.err (!%p470_p6)
}
 0x474   :  { %s474_s20 = scalar_lea.hbm %s583_s3, 128 }
 0x475   :  { %p475_p7 = scmp.ne.s32.totalorder %s583_s3, %s474_s20  ;;  %p478_p8 = scmp.lt.u32.totalorder %s474_s20, %s583_s3 }
 0x477   :  { %p480_p9 = pnand %p478_p8, %p475_p7 }
 0x479   :  { %483 = shalt.err (!%p480_p9)
}
 0x47a   :  { %324 = dma.vmem_to_hbm [thread:$0]  %s322_s16, 128, %s583_s3, [#allocation4]  }
 0x47b   :  { %488 = dma.done.wait [#allocation4], 128  }
 0x47c   :  { %489 = vsyncadd [#allocation4], 4294967168 }
 0x47d   :  { %328 = vsyncpa [#allocation3], 1 }
 0x47e   :  { %329 = vsyncpa [#allocation6], 1 }
 0x47f   :  { %330 = vsyncpa [#allocation4], 1 }

</bundles_post_ra>
